<compile_context>
chip_gen: v7x
topology: tpu7x:2x2x1
jax: 0.10.0
libtpu: 0.0.40
codegen_flags: <defaults>
</compile_context>

<pallas_src>
import jax
import jax.numpy as jnp
from jax.experimental import pallas as pl
from jax.experimental.pallas import tpu as pltpu

LANE = 128
TARGET_BLOCK_BYTES = 4 * 1024 * 1024   # ~4 MiB per block (dtype-aware row count)
VMEM_LIMIT_BYTES = 48 * 1024 * 1024    # room for 2-in + 2-out double-buffered blocks
PALLAS_MIN_ELEMS = 16 * 1024           # below this, fused jnp.where wins


def _clipped_relu_kernel(thr_ref, x_ref, o_ref):
    # thr_ref: (1,) f32 scalar-prefetch ref (SMEM); x_ref/o_ref: (tm, 128) VMEM tiles.
    x = x_ref[...]
    thr = thr_ref[0].astype(x_ref.dtype)   # cast the scalar, not the whole tile
    o_ref[...] = jnp.where(x <= thr, jnp.zeros_like(x), x)


def _round_up(v, m):
    return ((v + m - 1) // m) * m


def _pick_block_rows(rows, itemsize):
    """Dtype-aware block-row count targeting ~TARGET_BLOCK_BYTES per block."""
    rows_per_block = TARGET_BLOCK_BYTES // (LANE * itemsize)
    rows_per_block = max(32, (rows_per_block // 32) * 32)  # 8/16/32-sublane safe
    if rows <= rows_per_block:
        return rows  # single full-extent block (block == full dim is always legal)
    # Multi-block: even number of near-equal blocks -> balanced dual-TC on v7x.
    nblocks = pl.cdiv(rows, rows_per_block)
    if nblocks % 2:
        nblocks += 1
    return _round_up(pl.cdiv(rows, nblocks), 32)


def clipped_relu_pallas(x, threshold, *, donate_input=False):
    """Elementwise clipped ReLU: where(x <= threshold, 0, x).

    `threshold` may be a Python float or a traced scalar; it reaches the kernel
    via SMEM scalar prefetch, so distinct values do not trigger recompilation.
    """
    n = x.size
    thr = jnp.asarray(threshold, jnp.float32).reshape(())

    # Small inputs / ragged element counts: fused XLA elementwise is at roofline
    # and avoids custom-call launch overhead and extra padding/slicing HBM passes.
    if n < PALLAS_MIN_ELEMS or n % LANE != 0:
        return jnp.where(x <= thr.astype(x.dtype), jnp.zeros_like(x), x)

    rows = n // LANE
    x2 = x.reshape(rows, LANE)            # contiguous reshape -> bitcast, no copy
    tm = _pick_block_rows(rows, x2.dtype.itemsize)
    grid = (pl.cdiv(rows, tm),)

    out2 = pl.pallas_call(
        _clipped_relu_kernel,
        out_shape=jax.ShapeDtypeStruct((rows, LANE), x.dtype),
        grid_spec=pltpu.PrefetchScalarGridSpec(
            num_scalar_prefetch=1,
            grid=grid,
            in_specs=[pl.BlockSpec((tm, LANE), lambda i, thr_ref: (i, 0))],
            out_specs=pl.BlockSpec((tm, LANE), lambda i, thr_ref: (i, 0)),
        ),
        compiler_params=pltpu.CompilerParams(
            dimension_semantics=("parallel",),
            vmem_limit_bytes=VMEM_LIMIT_BYTES,
        ),
        # x2 is operand index 1 (after the prefetch scalar); aliasing it to output 0
        # avoids allocating a second full-size HBM buffer when x is donatable.
        input_output_aliases={1: 0} if donate_input else {},
    )(thr.reshape(1), x2)

    return out2.reshape(x.shape)


class RandomClippedReLU:
    """JAX/Pallas port of the PyTorch RandomClippedReLU module (no learnable params)."""

    def __init__(self, threshold_mean, threshold_std):
        self.threshold_mean = float(threshold_mean)
        self.threshold_std = float(threshold_std)

    def __call__(self, x, training=False, key=None):
        if training:
            # Sample threshold ~ N(mean, std), clamp at 0 (scalar-only glue work).
            t = (
                jax.random.normal(key, (1,), dtype=jnp.float32) * self.threshold_std
                + self.threshold_mean
            )
            t = jnp.maximum(t, 0.0)
            return clipped_relu_pallas(x, t)
        else:
            return clipped_relu_pallas(x, self.threshold_mean)


if __name__ == "__main__":
    root = jax.random.PRNGKey(0)
    kx, kb, kt1, kr = jax.random.split(root, 4)

    module = RandomClippedReLU(threshold_mean=0.5, threshold_std=0.1)

    # --- 1. Small NCHW activation (below the Pallas cutoff -> fused jnp bypass). ---
    x_small = jax.random.normal(kx, (2, 4, 16, 16), dtype=jnp.float32)
    out_eval_s = jax.block_until_ready(module(x_small, training=False))
    ref_eval_s = jnp.where(x_small <= 0.5, 0.0, x_small)
    assert out_eval_s.shape == x_small.shape and out_eval_s.dtype == x_small.dtype
    assert jnp.allclose(out_eval_s, ref_eval_s), "eval-mode mismatch (bypass path)"

    # --- 2. Larger activation: exercises the Pallas kernel (eval + train). ---
    x_big = jax.random.normal(kb, (2, 8, 64, 64), dtype=jnp.float32)  # 64K elems
    out_eval = jax.block_until_ready(module(x_big, training=False))
    ref_eval = jnp.where(x_big <= 0.5, 0.0, x_big)
    assert jnp.allclose(out_eval, ref_eval), "eval-mode mismatch (pallas path)"

    out_train = jax.block_until_ready(module(x_big, training=True, key=kt1))
    thr = jnp.maximum(
        jax.random.normal(kt1, (1,), dtype=jnp.float32) * 0.1 + 0.5, 0.0
    )[0]
    ref_train = jnp.where(x_big <= thr, 0.0, x_big)
    assert jnp.allclose(out_train, ref_train), "train-mode mismatch (pallas path)"

    # --- 3. Ragged element count above the cutoff -> fused jnp fallback path. ---
    x_rag = jax.random.normal(kr, (133, 129), dtype=jnp.float32)  # 17157 % 128 != 0
    out_rag = jax.block_until_ready(module(x_rag, training=False))
    assert jnp.allclose(out_rag, jnp.where(x_rag <= 0.5, 0.0, x_rag)), "ragged mismatch"

    print("KERNEL_OK")
</pallas_src>

<mosaic_0001>
module attributes {stable_mosaic.version = 11 : i64} {
  func.func @_clipped_relu_kernel(%arg0: i32, %arg1: memref<1xf32, #tpu.memory_space<smem>>, %arg2: memref<512x128xf32, #tpu.memory_space<vmem>>, %arg3: memref<512x128xf32, #tpu.memory_space<vmem>>) attributes {dimension_semantics = [#tpu.dimension_semantics<parallel>], iteration_bounds = array<i64: 1>, scalar_prefetch = 1 : i64, scratch_operands = 0 : i64, tpu.core_type = #tpu.core_type<tc>, window_params = [{transform_indices = @transform_0, window_bounds = array<i64: 512, 128>}, {transform_indices = @transform_1, window_bounds = array<i64: 512, 128>}]} {
    %c0 = arith.constant 0 : index
    %c0_0 = arith.constant 0 : index
    %0 = vector.load %arg2[%c0, %c0_0] : memref<512x128xf32, #tpu.memory_space<vmem>>, vector<512x128xf32>
    %c0_1 = arith.constant 0 : index
    %1 = memref.load %arg1[%c0_1] : memref<1xf32, #tpu.memory_space<smem>>
    %2 = vector.broadcast %1 : f32 to vector<512x128xf32>
    %3 = arith.cmpf ole, %0, %2 : vector<512x128xf32>
    %cst = arith.constant 0.000000e+00 : f32
    %4 = vector.broadcast %cst : f32 to vector<512x128xf32>
    %5 = arith.select %3, %4, %0 : vector<512x128xi1>, vector<512x128xf32>
    %c0_2 = arith.constant 0 : index
    %c0_3 = arith.constant 0 : index
    %6 = vector.load %arg3[%c0_2, %c0_3] : memref<512x128xf32, #tpu.memory_space<vmem>>, vector<512x128xf32>
    tpu.vector_store %arg3[%c0_2, %c0_3], %5 {strides = array<i32>} : memref<512x128xf32, #tpu.memory_space<vmem>>, vector<512x128xf32>,
    return
  }
  func.func @transform_0(%arg0: i32, %arg1: memref<1xf32, #tpu.memory_space<smem>>) -> (i32, i32) {
    %c0_i32 = arith.constant 0 : i32
    %c0_i32_0 = arith.constant 0 : i32
    return %arg0, %c0_i32 : i32, i32
  }
  func.func @transform_1(%arg0: i32, %arg1: memref<1xf32, #tpu.memory_space<smem>>) -> (i32, i32) {
    %c0_i32 = arith.constant 0 : i32
    %c0_i32_0 = arith.constant 0 : i32
    return %arg0, %c0_i32 : i32, i32
  }
}

</mosaic_0001>

<bundles_post_ra>
// kernel: tpu_custom_call.1
= control target key start
LH: loop header
LB: loop body
LE: loop exit
PB: predicated region body
PF: predicated region fallthrough
CT: control target
= control target key end

     0   :  { %8 = vsyncpa [#allocation5], 0  ;;  %s470_s0 = inlined_call_operand.<no memory space> [shape: f32[1], index: 0, kind: input, shape index: {}]   ;;  %s471_s1 = inlined_call_operand.hbm [shape: f32[512,128], index: 1, kind: input, shape index: {}]   ;;  %s472_s2 = inlined_call_operand.hbm [shape: f32[512,128], index: 2, kind: output, shape index: {}]  }
   0x1   :  { %9 = vsyncpa [#allocation6], 0  ;;  %s352_s9 = smov [#allocation4]   ;;  %s304_s13 = scalar_lea.hbm %s471_s1, 8192 }
   0x2   :  { %s15_s10 = sshll.u32 %s352_s9, 4  ;;  %p305_p0 = scmp.ne.s32.totalorder %s471_s1, %s304_s13  ;;  %s16_s10 = int_to_ptr.vmem [resolvable:$true] %s15_s10 }
   0x3   :  { %p308_p1 = scmp.lt.u32.totalorder %s304_s13, %s471_s1 }
   0x5   :  { %p310_p2 = pnand %p308_p1, %p305_p0 }
   0x7   :  { %313 = shalt.err (!%p310_p2)
}
   0x8   :  { %s314_s18 = scalar_lea.vmem %s16_s10, 8192  ;;  %p319_p4 = scmp.lt.s32.totalorder %s16_s10, %s16_s10 }
   0x9   :  { %p315_p3 = scmp.ne.s32.totalorder %s16_s10, %s314_s18  ;;  %p320_p5 = scmp.lt.s32.totalorder %s314_s18, %s314_s18 }
   0xb   :  { %p321_p6 = por %p320_p5, %p319_p4 }
   0xd   :  { %p322_p7 = pnand %p321_p6, %p315_p3 }
   0xf   :  { %325 = shalt.err (!%p322_p7)
}
  0x10   :  { %s353_s19 = smov 128   ;;  %s354_s20 = smov 8  }
  0x11   :  { %21 = dma.hbm_to_vmem [thread:$0]  %s471_s1, 8192, %s16_s10, [#allocation5], %s353_s19, %s353_s19, %s354_s20  }
  0x12   :  { %348 = dma.done.wait [#allocation5], 8192  }
  0x13   :  { %349 = vsyncadd [#allocation5], 4294959104  ;;  %v389_v0 = vstv %s470_s0  ;;  %v25_v1 = vld [vmem:[#allocation4] sm:$0xff]  ;;  %v26_v2 = vld [vmem:[#allocation4 + $0x8] sm:$0xff]  ;;  %s355_s0 = smov [#allocation7]  }
  0x14   :  { %v27_v3 = vld [vmem:[#allocation4 + $0x10] sm:$0xff]  ;;  %vm91_vm0 = vcmp.le.f32.partialorder %v25_v1, %v389_v0  ;;  %vm92_vm1 = vcmp.le.f32.partialorder %v26_v2, %v389_v0  ;;  %v28_v4 = vld [vmem:[#allocation4 + $0x18] sm:$0xff]  ;;  %v29_v5 = vld [vmem:[#allocation4 + $0x20] sm:$0xff]  ;;  %s288_s1 = sshll.u32 %s355_s0, 4  ;;  %s289_s1 = int_to_ptr.vmem [resolvable:$true] %s288_s1 }
  0x15   :  { %vm93_vm2 = vcmp.le.f32.partialorder %v27_v3, %v389_v0  ;;  %v30_v6 = vld [vmem:[#allocation4 + $0x28] sm:$0xff]  ;;  %v155_v7 = vsel %vm91_vm0, 0.0, %v25_v1  ;;  %v156_v8 = vsel %vm92_vm1, 0.0, %v26_v2  ;;  %vm94_vm3 = vcmp.le.f32.partialorder %v28_v4, %v389_v0  ;;  %v31_v10 = vld [vmem:[#allocation4 + $0x30] sm:$0xff]  ;;  %v32_v11 = vld [vmem:[#allocation4 + $0x38] sm:$0xff]  ;;  %s326_s25 = scalar_lea.vmem %s289_s1, 8192  ;;  %p331_p9 = scmp.lt.s32.totalorder %s289_s1, %s289_s1 }
  0x16   :  { %v157_v9 = vsel %vm93_vm2, 0.0, %v27_v3  ;;  %v33_v12 = vld [vmem:[#allocation4 + $0x40] sm:$0xff]  ;;  %219 = vst [vmem:[#allocation7] sm:$0xff] %v155_v7  ;;  %220 = vst [vmem:[#allocation7 + $0x8] sm:$0xff] %v156_v8  ;;  %v158_v13 = vsel %vm94_vm3, 0.0, %v28_v4  ;;  %vm95_vm4 = vcmp.le.f32.partialorder %v29_v5, %v389_v0  ;;  %vm96_vm5 = vcmp.le.f32.partialorder %v30_v6, %v389_v0  ;;  %v34_v14 = vld [vmem:[#allocation4 + $0x48] sm:$0xff]  ;;  %p327_p8 = scmp.ne.s32.totalorder %s289_s1, %s326_s25  ;;  %p332_p10 = scmp.lt.s32.totalorder %s326_s25, %s326_s25 }
  0x17   :  { %221 = vst [vmem:[#allocation7 + $0x10] sm:$0xff] %v157_v9  ;;  %vm97_vm6 = vcmp.le.f32.partialorder %v31_v10, %v389_v0  ;;  %v35_v15 = vld [vmem:[#allocation4 + $0x50] sm:$0xff]  ;;  %v36_v16 = vld [vmem:[#allocation4 + $0x58] sm:$0xff]  ;;  %222 = vst [vmem:[#allocation7 + $0x18] sm:$0xff] %v158_v13  ;;  %v159_v17 = vsel %vm95_vm4, 0.0, %v29_v5  ;;  %v160_v18 = vsel %vm96_vm5, 0.0, %v30_v6  ;;  %vm98_vm7 = vcmp.le.f32.partialorder %v32_v11, %v389_v0 }
  0x18   :  { %v161_v19 = vsel %vm97_vm6, 0.0, %v31_v10  ;;  %v37_v20 = vld [vmem:[#allocation4 + $0x60] sm:$0xff]  ;;  %v38_v21 = vld [vmem:[#allocation4 + $0x68] sm:$0xff]  ;;  %v39_v22 = vld [vmem:[#allocation4 + $0x70] sm:$0xff]  ;;  %223 = vst [vmem:[#allocation7 + $0x20] sm:$0xff] %v159_v17  ;;  %v162_v23 = vsel %vm98_vm7, 0.0, %v32_v11  ;;  %vm99_vm8 = vcmp.le.f32.partialorder %v33_v12, %v389_v0  ;;  %vm100_vm9 = vcmp.le.f32.partialorder %v34_v14, %v389_v0  ;;  %p333_p11 = por %p332_p10, %p331_p9 }
  0x19   :  { %224 = vst [vmem:[#allocation7 + $0x28] sm:$0xff] %v160_v18  ;;  %225 = vst [vmem:[#allocation7 + $0x30] sm:$0xff] %v161_v19  ;;  %vm101_vm10 = vcmp.le.f32.partialorder %v35_v15, %v389_v0  ;;  %v40_v24 = vld [vmem:[#allocation4 + $0x78] sm:$0xff]  ;;  %v163_v25 = vsel %vm99_vm8, 0.0, %v33_v12  ;;  %v164_v26 = vsel %vm100_vm9, 0.0, %v34_v14  ;;  %vm102_vm11 = vcmp.le.f32.partialorder %v36_v16, %v389_v0  ;;  %v41_v28 = vld [vmem:[#allocation4 + $0x80] sm:$0xff] }
  0x1a   :  { %226 = vst [vmem:[#allocation7 + $0x38] sm:$0xff] %v162_v23  ;;  %v165_v27 = vsel %vm101_vm10, 0.0, %v35_v15  ;;  %v42_v29 = vld [vmem:[#allocation4 + $0x88] sm:$0xff]  ;;  %v43_v30 = vld [vmem:[#allocation4 + $0x90] sm:$0xff]  ;;  %227 = vst [vmem:[#allocation7 + $0x40] sm:$0xff] %v163_v25  ;;  %v166_v31 = vsel %vm102_vm11, 0.0, %v36_v16  ;;  %vm103_vm12 = vcmp.le.f32.partialorder %v37_v20, %v389_v0  ;;  %vm104_vm13 = vcmp.le.f32.partialorder %v38_v21, %v389_v0  ;;  %p334_p12 = pnand %p333_p11, %p327_p8 }
  0x1b   :  { %228 = vst [vmem:[#allocation7 + $0x48] sm:$0xff] %v164_v26  ;;  %229 = vst [vmem:[#allocation7 + $0x50] sm:$0xff] %v165_v27  ;;  %vm105_vm14 = vcmp.le.f32.partialorder %v39_v22, %v389_v0  ;;  %v44_v32 = vld [vmem:[#allocation4 + $0x98] sm:$0xff]  ;;  %v167_v33 = vsel %vm103_vm12, 0.0, %v37_v20  ;;  %v168_v34 = vsel %vm104_vm13, 0.0, %v38_v21  ;;  %vm106_vm15 = vcmp.le.f32.partialorder %v40_v24, %v389_v0  ;;  %v45_v36 = vld [vmem:[#allocation4 + $0xa0] sm:$0xff] }
  0x1c   :  { %230 = vst [vmem:[#allocation7 + $0x58] sm:$0xff] %v166_v31  ;;  %v169_v35 = vsel %vm105_vm14, 0.0, %v39_v22  ;;  %v46_v37 = vld [vmem:[#allocation4 + $0xa8] sm:$0xff]  ;;  %v47_v38 = vld [vmem:[#allocation4 + $0xb0] sm:$0xff]  ;;  %231 = vst [vmem:[#allocation7 + $0x60] sm:$0xff] %v167_v33  ;;  %v170_v39 = vsel %vm106_vm15, 0.0, %v40_v24  ;;  %vm107_vm0 = vcmp.le.f32.partialorder %v41_v28, %v389_v0  ;;  %vm108_vm1 = vcmp.le.f32.partialorder %v42_v29, %v389_v0 }
  0x1d   :  { %232 = vst [vmem:[#allocation7 + $0x68] sm:$0xff] %v168_v34  ;;  %233 = vst [vmem:[#allocation7 + $0x70] sm:$0xff] %v169_v35  ;;  %vm109_vm2 = vcmp.le.f32.partialorder %v43_v30, %v389_v0  ;;  %v48_v40 = vld [vmem:[#allocation4 + $0xb8] sm:$0xff]  ;;  %v171_v41 = vsel %vm107_vm0, 0.0, %v41_v28  ;;  %v172_v42 = vsel %vm108_vm1, 0.0, %v42_v29  ;;  %vm110_vm3 = vcmp.le.f32.partialorder %v44_v32, %v389_v0  ;;  %v49_v44 = vld [vmem:[#allocation4 + $0xc0] sm:$0xff] }
  0x1e   :  { %234 = vst [vmem:[#allocation7 + $0x78] sm:$0xff] %v170_v39  ;;  %v173_v43 = vsel %vm109_vm2, 0.0, %v43_v30  ;;  %v50_v45 = vld [vmem:[#allocation4 + $0xc8] sm:$0xff]  ;;  %v51_v46 = vld [vmem:[#allocation4 + $0xd0] sm:$0xff]  ;;  %235 = vst [vmem:[#allocation7 + $0x80] sm:$0xff] %v171_v41  ;;  %v174_v47 = vsel %vm110_vm3, 0.0, %v44_v32  ;;  %vm111_vm4 = vcmp.le.f32.partialorder %v45_v36, %v389_v0  ;;  %vm112_vm5 = vcmp.le.f32.partialorder %v46_v37, %v389_v0 }
  0x1f   :  { %236 = vst [vmem:[#allocation7 + $0x88] sm:$0xff] %v172_v42  ;;  %237 = vst [vmem:[#allocation7 + $0x90] sm:$0xff] %v173_v43  ;;  %vm113_vm6 = vcmp.le.f32.partialorder %v47_v38, %v389_v0  ;;  %v52_v48 = vld [vmem:[#allocation4 + $0xd8] sm:$0xff]  ;;  %v175_v49 = vsel %vm111_vm4, 0.0, %v45_v36  ;;  %v176_v50 = vsel %vm112_vm5, 0.0, %v46_v37  ;;  %vm114_vm7 = vcmp.le.f32.partialorder %v48_v40, %v389_v0  ;;  %v53_v52 = vld [vmem:[#allocation4 + $0xe0] sm:$0xff] }
  0x20   :  { %238 = vst [vmem:[#allocation7 + $0x98] sm:$0xff] %v174_v47  ;;  %v177_v51 = vsel %vm113_vm6, 0.0, %v47_v38  ;;  %v54_v53 = vld [vmem:[#allocation4 + $0xe8] sm:$0xff]  ;;  %v55_v54 = vld [vmem:[#allocation4 + $0xf0] sm:$0xff]  ;;  %239 = vst [vmem:[#allocation7 + $0xa0] sm:$0xff] %v175_v49  ;;  %v178_v55 = vsel %vm114_vm7, 0.0, %v48_v40  ;;  %vm115_vm8 = vcmp.le.f32.partialorder %v49_v44, %v389_v0  ;;  %vm116_vm9 = vcmp.le.f32.partialorder %v50_v45, %v389_v0 }
  0x21   :  { %240 = vst [vmem:[#allocation7 + $0xa8] sm:$0xff] %v176_v50  ;;  %241 = vst [vmem:[#allocation7 + $0xb0] sm:$0xff] %v177_v51  ;;  %vm117_vm10 = vcmp.le.f32.partialorder %v51_v46, %v389_v0  ;;  %v56_v56 = vld [vmem:[#allocation4 + $0xf8] sm:$0xff]  ;;  %v179_v57 = vsel %vm115_vm8, 0.0, %v49_v44  ;;  %v180_v58 = vsel %vm116_vm9, 0.0, %v50_v45  ;;  %vm118_vm11 = vcmp.le.f32.partialorder %v52_v48, %v389_v0  ;;  %v57_v60 = vld [vmem:[#allocation4 + $0x100] sm:$0xff] }
  0x22   :  { %242 = vst [vmem:[#allocation7 + $0xb8] sm:$0xff] %v178_v55  ;;  %v181_v59 = vsel %vm117_vm10, 0.0, %v51_v46  ;;  %v58_v61 = vld [vmem:[#allocation4 + $0x108] sm:$0xff]  ;;  %v59_v62 = vld [vmem:[#allocation4 + $0x110] sm:$0xff]  ;;  %243 = vst [vmem:[#allocation7 + $0xc0] sm:$0xff] %v179_v57  ;;  %v182_v63 = vsel %vm118_vm11, 0.0, %v52_v48  ;;  %vm119_vm12 = vcmp.le.f32.partialorder %v53_v52, %v389_v0  ;;  %vm120_vm13 = vcmp.le.f32.partialorder %v54_v53, %v389_v0 }
  0x23   :  { %244 = vst [vmem:[#allocation7 + $0xc8] sm:$0xff] %v180_v58  ;;  %245 = vst [vmem:[#allocation7 + $0xd0] sm:$0xff] %v181_v59  ;;  %vm121_vm14 = vcmp.le.f32.partialorder %v55_v54, %v389_v0  ;;  %v60_v1 = vld [vmem:[#allocation4 + $0x118] sm:$0xff]  ;;  %v183_v2 = vsel %vm119_vm12, 0.0, %v53_v52  ;;  %v184_v3 = vsel %vm120_vm13, 0.0, %v54_v53  ;;  %vm122_vm15 = vcmp.le.f32.partialorder %v56_v56, %v389_v0  ;;  %v61_v5 = vld [vmem:[#allocation4 + $0x120] sm:$0xff] }
  0x24   :  { %246 = vst [vmem:[#allocation7 + $0xd8] sm:$0xff] %v182_v63  ;;  %v185_v4 = vsel %vm121_vm14, 0.0, %v55_v54  ;;  %v62_v6 = vld [vmem:[#allocation4 + $0x128] sm:$0xff]  ;;  %v63_v7 = vld [vmem:[#allocation4 + $0x130] sm:$0xff]  ;;  %247 = vst [vmem:[#allocation7 + $0xe0] sm:$0xff] %v183_v2  ;;  %v186_v8 = vsel %vm122_vm15, 0.0, %v56_v56  ;;  %vm123_vm0 = vcmp.le.f32.partialorder %v57_v60, %v389_v0  ;;  %vm124_vm1 = vcmp.le.f32.partialorder %v58_v61, %v389_v0 }
  0x25   :  { %248 = vst [vmem:[#allocation7 + $0xe8] sm:$0xff] %v184_v3  ;;  %249 = vst [vmem:[#allocation7 + $0xf0] sm:$0xff] %v185_v4  ;;  %vm125_vm2 = vcmp.le.f32.partialorder %v59_v62, %v389_v0  ;;  %v64_v9 = vld [vmem:[#allocation4 + $0x138] sm:$0xff]  ;;  %v187_v10 = vsel %vm123_vm0, 0.0, %v57_v60  ;;  %v188_v11 = vsel %vm124_vm1, 0.0, %v58_v61  ;;  %vm126_vm3 = vcmp.le.f32.partialorder %v60_v1, %v389_v0  ;;  %v65_v13 = vld [vmem:[#allocation4 + $0x140] sm:$0xff] }
  0x26   :  { %250 = vst [vmem:[#allocation7 + $0xf8] sm:$0xff] %v186_v8  ;;  %v189_v12 = vsel %vm125_vm2, 0.0, %v59_v62  ;;  %v66_v14 = vld [vmem:[#allocation4 + $0x148] sm:$0xff]  ;;  %v67_v15 = vld [vmem:[#allocation4 + $0x150] sm:$0xff]  ;;  %251 = vst [vmem:[#allocation7 + $0x100] sm:$0xff] %v187_v10  ;;  %v190_v16 = vsel %vm126_vm3, 0.0, %v60_v1  ;;  %vm127_vm4 = vcmp.le.f32.partialorder %v61_v5, %v389_v0  ;;  %vm128_vm5 = vcmp.le.f32.partialorder %v62_v6, %v389_v0 }
  0x27   :  { %252 = vst [vmem:[#allocation7 + $0x108] sm:$0xff] %v188_v11  ;;  %253 = vst [vmem:[#allocation7 + $0x110] sm:$0xff] %v189_v12  ;;  %vm129_vm6 = vcmp.le.f32.partialorder %v63_v7, %v389_v0  ;;  %v68_v17 = vld [vmem:[#allocation4 + $0x158] sm:$0xff]  ;;  %v191_v18 = vsel %vm127_vm4, 0.0, %v61_v5  ;;  %v192_v19 = vsel %vm128_vm5, 0.0, %v62_v6  ;;  %vm130_vm7 = vcmp.le.f32.partialorder %v64_v9, %v389_v0  ;;  %v69_v21 = vld [vmem:[#allocation4 + $0x160] sm:$0xff] }
  0x28   :  { %254 = vst [vmem:[#allocation7 + $0x118] sm:$0xff] %v190_v16  ;;  %v193_v20 = vsel %vm129_vm6, 0.0, %v63_v7  ;;  %v70_v22 = vld [vmem:[#allocation4 + $0x168] sm:$0xff]  ;;  %v71_v23 = vld [vmem:[#allocation4 + $0x170] sm:$0xff]  ;;  %255 = vst [vmem:[#allocation7 + $0x120] sm:$0xff] %v191_v18  ;;  %v194_v24 = vsel %vm130_vm7, 0.0, %v64_v9  ;;  %vm131_vm8 = vcmp.le.f32.partialorder %v65_v13, %v389_v0  ;;  %vm132_vm9 = vcmp.le.f32.partialorder %v66_v14, %v389_v0 }
  0x29   :  { %256 = vst [vmem:[#allocation7 + $0x128] sm:$0xff] %v192_v19  ;;  %257 = vst [vmem:[#allocation7 + $0x130] sm:$0xff] %v193_v20  ;;  %vm133_vm10 = vcmp.le.f32.partialorder %v67_v15, %v389_v0  ;;  %v72_v25 = vld [vmem:[#allocation4 + $0x178] sm:$0xff]  ;;  %v195_v26 = vsel %vm131_vm8, 0.0, %v65_v13  ;;  %v196_v27 = vsel %vm132_vm9, 0.0, %v66_v14  ;;  %vm134_vm11 = vcmp.le.f32.partialorder %v68_v17, %v389_v0  ;;  %v73_v29 = vld [vmem:[#allocation4 + $0x180] sm:$0xff] }
  0x2a   :  { %258 = vst [vmem:[#allocation7 + $0x138] sm:$0xff] %v194_v24  ;;  %v197_v28 = vsel %vm133_vm10, 0.0, %v67_v15  ;;  %v74_v30 = vld [vmem:[#allocation4 + $0x188] sm:$0xff]  ;;  %v75_v31 = vld [vmem:[#allocation4 + $0x190] sm:$0xff]  ;;  %259 = vst [vmem:[#allocation7 + $0x140] sm:$0xff] %v195_v26  ;;  %v198_v32 = vsel %vm134_vm11, 0.0, %v68_v17  ;;  %vm135_vm12 = vcmp.le.f32.partialorder %v69_v21, %v389_v0  ;;  %vm136_vm13 = vcmp.le.f32.partialorder %v70_v22, %v389_v0 }
  0x2b   :  { %260 = vst [vmem:[#allocation7 + $0x148] sm:$0xff] %v196_v27  ;;  %261 = vst [vmem:[#allocation7 + $0x150] sm:$0xff] %v197_v28  ;;  %vm137_vm14 = vcmp.le.f32.partialorder %v71_v23, %v389_v0  ;;  %v76_v33 = vld [vmem:[#allocation4 + $0x198] sm:$0xff]  ;;  %v199_v34 = vsel %vm135_vm12, 0.0, %v69_v21  ;;  %v200_v35 = vsel %vm136_vm13, 0.0, %v70_v22  ;;  %vm138_vm15 = vcmp.le.f32.partialorder %v72_v25, %v389_v0  ;;  %v77_v37 = vld [vmem:[#allocation4 + $0x1a0] sm:$0xff] }
  0x2c   :  { %262 = vst [vmem:[#allocation7 + $0x158] sm:$0xff] %v198_v32  ;;  %v201_v36 = vsel %vm137_vm14, 0.0, %v71_v23  ;;  %v78_v38 = vld [vmem:[#allocation4 + $0x1a8] sm:$0xff]  ;;  %v79_v39 = vld [vmem:[#allocation4 + $0x1b0] sm:$0xff]  ;;  %263 = vst [vmem:[#allocation7 + $0x160] sm:$0xff] %v199_v34  ;;  %v202_v40 = vsel %vm138_vm15, 0.0, %v72_v25  ;;  %vm139_vm0 = vcmp.le.f32.partialorder %v73_v29, %v389_v0  ;;  %vm140_vm1 = vcmp.le.f32.partialorder %v74_v30, %v389_v0 }
  0x2d   :  { %264 = vst [vmem:[#allocation7 + $0x168] sm:$0xff] %v200_v35  ;;  %265 = vst [vmem:[#allocation7 + $0x170] sm:$0xff] %v201_v36  ;;  %vm141_vm2 = vcmp.le.f32.partialorder %v75_v31, %v389_v0  ;;  %v80_v41 = vld [vmem:[#allocation4 + $0x1b8] sm:$0xff]  ;;  %v203_v42 = vsel %vm139_vm0, 0.0, %v73_v29  ;;  %v204_v43 = vsel %vm140_vm1, 0.0, %v74_v30  ;;  %vm142_vm3 = vcmp.le.f32.partialorder %v76_v33, %v389_v0  ;;  %v81_v45 = vld [vmem:[#allocation4 + $0x1c0] sm:$0xff] }
  0x2e   :  { %266 = vst [vmem:[#allocation7 + $0x178] sm:$0xff] %v202_v40  ;;  %v205_v44 = vsel %vm141_vm2, 0.0, %v75_v31  ;;  %v82_v46 = vld [vmem:[#allocation4 + $0x1c8] sm:$0xff]  ;;  %v83_v47 = vld [vmem:[#allocation4 + $0x1d0] sm:$0xff]  ;;  %267 = vst [vmem:[#allocation7 + $0x180] sm:$0xff] %v203_v42  ;;  %v206_v48 = vsel %vm142_vm3, 0.0, %v76_v33  ;;  %vm143_vm4 = vcmp.le.f32.partialorder %v77_v37, %v389_v0  ;;  %vm144_vm5 = vcmp.le.f32.partialorder %v78_v38, %v389_v0 }
  0x2f   :  { %268 = vst [vmem:[#allocation7 + $0x188] sm:$0xff] %v204_v43  ;;  %269 = vst [vmem:[#allocation7 + $0x190] sm:$0xff] %v205_v44  ;;  %vm145_vm6 = vcmp.le.f32.partialorder %v79_v39, %v389_v0  ;;  %v84_v49 = vld [vmem:[#allocation4 + $0x1d8] sm:$0xff]  ;;  %v207_v50 = vsel %vm143_vm4, 0.0, %v77_v37  ;;  %v208_v51 = vsel %vm144_vm5, 0.0, %v78_v38  ;;  %vm146_vm7 = vcmp.le.f32.partialorder %v80_v41, %v389_v0  ;;  %v85_v53 = vld [vmem:[#allocation4 + $0x1e0] sm:$0xff] }
  0x30   :  { %270 = vst [vmem:[#allocation7 + $0x198] sm:$0xff] %v206_v48  ;;  %v209_v52 = vsel %vm145_vm6, 0.0, %v79_v39  ;;  %v86_v54 = vld [vmem:[#allocation4 + $0x1e8] sm:$0xff]  ;;  %v87_v55 = vld [vmem:[#allocation4 + $0x1f0] sm:$0xff]  ;;  %271 = vst [vmem:[#allocation7 + $0x1a0] sm:$0xff] %v207_v50  ;;  %v210_v56 = vsel %vm146_vm7, 0.0, %v80_v41  ;;  %vm147_vm8 = vcmp.le.f32.partialorder %v81_v45, %v389_v0  ;;  %vm148_vm9 = vcmp.le.f32.partialorder %v82_v46, %v389_v0 }
  0x31   :  { %272 = vst [vmem:[#allocation7 + $0x1a8] sm:$0xff] %v208_v51  ;;  %273 = vst [vmem:[#allocation7 + $0x1b0] sm:$0xff] %v209_v52  ;;  %vm149_vm10 = vcmp.le.f32.partialorder %v83_v47, %v389_v0  ;;  %v88_v57 = vld [vmem:[#allocation4 + $0x1f8] sm:$0xff]  ;;  %v211_v58 = vsel %vm147_vm8, 0.0, %v81_v45  ;;  %v212_v59 = vsel %vm148_vm9, 0.0, %v82_v46  ;;  %vm150_vm11 = vcmp.le.f32.partialorder %v84_v49, %v389_v0 }
  0x32   :  { %274 = vst [vmem:[#allocation7 + $0x1b8] sm:$0xff] %v210_v56  ;;  %v213_v60 = vsel %vm149_vm10, 0.0, %v83_v47  ;;  %275 = vst [vmem:[#allocation7 + $0x1c0] sm:$0xff] %v211_v58  ;;  %v214_v61 = vsel %vm150_vm11, 0.0, %v84_v49  ;;  %vm151_vm12 = vcmp.le.f32.partialorder %v85_v53, %v389_v0  ;;  %vm152_vm13 = vcmp.le.f32.partialorder %v86_v54, %v389_v0 }
  0x33   :  { %276 = vst [vmem:[#allocation7 + $0x1c8] sm:$0xff] %v212_v59  ;;  %277 = vst [vmem:[#allocation7 + $0x1d0] sm:$0xff] %v213_v60  ;;  %vm153_vm14 = vcmp.le.f32.partialorder %v87_v55, %v389_v0  ;;  %v215_v62 = vsel %vm151_vm12, 0.0, %v85_v53  ;;  %v216_v63 = vsel %vm152_vm13, 0.0, %v86_v54  ;;  %vm154_vm15 = vcmp.le.f32.partialorder %v88_v57, %v389_v0 }
  0x34   :  { %278 = vst [vmem:[#allocation7 + $0x1d8] sm:$0xff] %v214_v61  ;;  %v217_v1 = vsel %vm153_vm14, 0.0, %v87_v55  ;;  %279 = vst [vmem:[#allocation7 + $0x1e0] sm:$0xff] %v215_v62  ;;  %v218_v2 = vsel %vm154_vm15, 0.0, %v88_v57 }
  0x35   :  { %280 = vst [vmem:[#allocation7 + $0x1e8] sm:$0xff] %v216_v63  ;;  %281 = vst [vmem:[#allocation7 + $0x1f0] sm:$0xff] %v217_v1 }
  0x36   :  { %282 = vst [vmem:[#allocation7 + $0x1f8] sm:$0xff] %v218_v2 }
  0x37   :  { %337 = shalt.err (!%p334_p12)
}
  0x38   :  { %s338_s28 = scalar_lea.hbm %s472_s2, 8192 }
  0x39   :  { %p339_p13 = scmp.ne.s32.totalorder %s472_s2, %s338_s28  ;;  %p342_p0 = scmp.lt.u32.totalorder %s338_s28, %s472_s2 }
  0x3b   :  { %p344_p1 = pnand %p342_p0, %p339_p13 }
  0x3d   :  { %347 = shalt.err (!%p344_p1)
}
  0x3e   :  { %294 = dma.vmem_to_hbm [thread:$0]  %s289_s1, 8192, %s472_s2, [#allocation6], %s353_s19, %s353_s19, %s354_s20  }
  0x3f   :  { %350 = dma.done.wait [#allocation6], 8192  }
  0x40   :  { %351 = vsyncadd [#allocation6], 4294959104 }
  0x41   :  { %298 = vsyncpa [#allocation5], 1 }
  0x42   :  { %299 = vsyncpa [#allocation6], 1 }

</bundles_post_ra>
